<compile_context>
chip_gen: v7x
topology: tpu7x:2x2x1
jax: 0.10.0
libtpu: 0.0.40
codegen_flags: <defaults>
</compile_context>

<pallas_src>
import jax
import jax.numpy as jnp
from jax.experimental import pallas as pl
from jax.experimental.pallas import tpu as pltpu


def _round_up(x, m):
    return (x + m - 1) // m * m


def actor_kernel(s_ref, w1_ref, b1_ref, w2_ref, b2_ref, w3_ref, b3_ref,
                 out_ref):
    """One batch tile: (layer_s folded into layer1) -> relu -> layer2 -> relu
    -> layer3(+cash logit) -> softmax.  Matmuls run in the weights' dtype
    (bf16 or f32) with f32 accumulation; the elementwise epilogue is f32."""
    mm_dtype = w1_ref.dtype

    # layer1 with layer_s folded in: (TB, K*7) @ (K*7, 128) + b1_eff, ReLU.
    h1 = jnp.dot(s_ref[...], w1_ref[...],
                 preferred_element_type=jnp.float32) + b1_ref[...]
    h1 = jnp.maximum(h1, 0.0)

    # layer2, ReLU.
    h2 = jnp.dot(h1.astype(mm_dtype), w2_ref[...],
                 preferred_element_type=jnp.float32) + b2_ref[...]
    h2 = jnp.maximum(h2, 0.0)

    # layer3 widened to lane-dense (TB, 128): column 0 carries the 0.1 cash
    # logit, columns > K carry a -1e30 f32 bias so they vanish under softmax.
    logits = jnp.dot(h2.astype(mm_dtype), w3_ref[...],
                     preferred_element_type=jnp.float32) + b3_ref[...]

    m = jnp.max(logits, axis=-1, keepdims=True)
    e = jnp.exp(logits - m)
    denom = jnp.sum(e, axis=-1, keepdims=True)
    # Exact reciprocal: denom is only (TB, 1); keeps probabilities summing to 1.
    out_ref[...] = (e * pl.reciprocal(denom)).astype(out_ref.dtype)


def prepare_actor_params(params, *, matmul_dtype=jnp.bfloat16):
    """Host-side weight prep, done ONCE per parameter set (hoisted out of the
    per-call path).  Folds layer_s into layer1 and the cash logit into layer3."""
    Ws = params["Ws"].astype(jnp.float32)        # (64, 7)
    bs = params["bs"].astype(jnp.float32)        # (64,)
    W1 = params["W1"].astype(jnp.float32)        # (128, 64*K)
    b1 = params["b1"].astype(jnp.float32)        # (128,)
    W2 = params["W2"].astype(jnp.float32)        # (64, 128)
    b2 = params["b2"].astype(jnp.float32)        # (64,)
    W3 = params["W3"].astype(jnp.float32)        # (K, 64)
    b3 = params["b3"].astype(jnp.float32)        # (K,)

    H_S = Ws.shape[0]                            # 64
    d_in = Ws.shape[1]                           # 7
    K = W1.shape[1] // H_S

    # Fold layer_s into layer1 per asset (no block-diagonal materialized):
    #   W_eff[i*7:(i+1)*7, :] = Ws^T @ W1^T[i*64:(i+1)*64, :]
    w1_t = W1.T                                                   # (K*64, 128)
    w1_t_r = w1_t.reshape(K, H_S, 128)
    w_eff = jnp.einsum("fh,khd->kfd", Ws.T, w1_t_r).reshape(K * d_in, 128)
    b1_eff = (b1 + jnp.tile(bs, K) @ w1_t)[None, :]               # (1, 128)

    w2_t = W2.T                                                   # (128, 64)
    b2_row = b2[None, :]                                          # (1, 64)

    # layer3 widened to a lane-dense 128-wide output with the cash logit folded
    # into the bias.  NOTE: b3_ext must remain f32 (-1e30 saturates in bf16).
    N_out = _round_up(K + 1, 128)
    w3_t = W3.T                                                   # (64, K)
    w3_ext = jnp.zeros((w3_t.shape[0], N_out), jnp.float32).at[:, 1:K + 1].set(w3_t)
    b3_ext = (jnp.full((N_out,), -1e30, jnp.float32)
              .at[0].set(0.1)
              .at[1:K + 1].set(b3))[None, :]                      # (1, N_out)

    return {
        "w_eff": w_eff.astype(matmul_dtype),
        "b1_eff": b1_eff.astype(jnp.float32),
        "w2_t": w2_t.astype(matmul_dtype),
        "b2": b2_row.astype(jnp.float32),
        "w3_ext": w3_ext.astype(matmul_dtype),
        "b3_ext": b3_ext.astype(jnp.float32),   # keep f32 (see note above)
        "K": K,
        "d_in": d_in,
    }


def actor_forward(s1_tensor, portfolio, prepared, *,
                  block_b=1024, out_dtype=jnp.bfloat16):
    """s1_tensor: (B, K, 5) f32; portfolio: (B, K+1, 1) f32 -> (B, K+1) f32."""
    B, K, F1 = s1_tensor.shape
    d_in = F1 + 2                                # 7
    assert K == prepared["K"] and d_in == prepared["d_in"]
    mm_dtype = prepared["w_eff"].dtype
    N_out = prepared["w3_ext"].shape[1]          # 128-multiple, lane-dense

    # ---- Pack the per-asset concatenated state as (B, K*7): pure reshape. ----
    cash = jnp.broadcast_to(portfolio[:, 0:1, :], (B, K, 1))      # portfolio[:, 0]
    asset_w = portfolio[:, 1:, :]                                 # portfolio[:, i+1]
    s_cat = jnp.concatenate(
        [s1_tensor.astype(jnp.float32),
         cash.astype(jnp.float32),
         asset_w.astype(jnp.float32)], axis=-1)                   # (B, K, 7)
    s_packed = s_cat.reshape(B, K * d_in).astype(mm_dtype)        # (B, K*7)

    # ---- Batch tiling: minimize padding, and use >= 2 grid steps so the
    #      "parallel" axis shards across both TensorCores on v7x. ----
    n_steps = max(2, -(-B // block_b))
    TB = _round_up(-(-B // n_steps), 8)
    B_pad = _round_up(B, TB)
    if B_pad != B:
        s_packed = jnp.pad(s_packed, ((0, B_pad - B), (0, 0)))
    grid = (B_pad // TB,)

    in_itemsize = jnp.dtype(mm_dtype).itemsize
    out_itemsize = jnp.dtype(out_dtype).itemsize
    weight_bytes = sum(int(prepared[k].size) * prepared[k].dtype.itemsize
                       for k in ("w_eff", "b1_eff", "w2_t", "b2",
                                 "w3_ext", "b3_ext"))
    cost = pl.CostEstimate(
        flops=int(2 * B_pad * (K * d_in * 128 + 128 * 64 + 64 * N_out)),
        transcendentals=int(B_pad * N_out),
        bytes_accessed=int(B_pad * (K * d_in * in_itemsize
                                    + N_out * out_itemsize) + weight_bytes),
    )

    const2 = lambda i: (0, 0)
    out = pl.pallas_call(
        actor_kernel,
        out_shape=jax.ShapeDtypeStruct((B_pad, N_out), out_dtype),
        grid=grid,
        in_specs=[
            pl.BlockSpec((TB, K * d_in), lambda i: (i, 0)),   # packed state
            pl.BlockSpec(prepared["w_eff"].shape, const2),    # folded Ws@W1^T
            pl.BlockSpec(prepared["b1_eff"].shape, const2),
            pl.BlockSpec(prepared["w2_t"].shape, const2),
            pl.BlockSpec(prepared["b2"].shape, const2),
            pl.BlockSpec(prepared["w3_ext"].shape, const2),
            pl.BlockSpec(prepared["b3_ext"].shape, const2),
        ],
        out_specs=pl.BlockSpec((TB, N_out), lambda i: (i, 0)),
        compiler_params=pltpu.CompilerParams(
            dimension_semantics=("parallel",)),
        cost_estimate=cost,
    )(s_packed, prepared["w_eff"], prepared["b1_eff"],
      prepared["w2_t"], prepared["b2"],
      prepared["w3_ext"], prepared["b3_ext"])

    # Slice to the valid (B, K+1) block and return f32 (module semantics).
    return out[:B, :K + 1].astype(jnp.float32)


def init_params(key, K, state1_dim=5, state2_dim=2):
    """Deterministic synthetic init mirroring the module's shapes
    (kaiming-normal for layer1/2/3 weights, PyTorch-default-style elsewhere)."""
    d_in = state1_dim + state2_dim      # 7
    keys = jax.random.split(key, 8)

    def uniform(k, shape, fan_in):
        bound = 1.0 / jnp.sqrt(fan_in)
        return jax.random.uniform(k, shape, jnp.float32, -bound, bound)

    def kaiming(k, shape):              # shape = (out, in), gain=sqrt(2) for relu
        std = jnp.sqrt(2.0 / shape[1])
        return std * jax.random.normal(k, shape, jnp.float32)

    return {
        "Ws": uniform(keys[0], (64, d_in), d_in),
        "bs": uniform(keys[1], (64,), d_in),
        "W1": kaiming(keys[2], (128, 64 * K)),
        "b1": uniform(keys[3], (128,), 64 * K),
        "W2": kaiming(keys[4], (64, 128)),
        "b2": uniform(keys[5], (64,), 128),
        "W3": kaiming(keys[6], (K, 64)),
        "b3": uniform(keys[7], (K,), 64),
    }


def actor_forward_ref(s1_tensor, portfolio, params):
    """Pure-JAX reference of the PyTorch forward (for validation)."""
    B, K, _ = s1_tensor.shape
    scores = []
    for i in range(K):
        s = jnp.concatenate(
            [s1_tensor[:, i, :], portfolio[:, 0], portfolio[:, i + 1]], axis=-1)
        scores.append(s @ params["Ws"].T + params["bs"])
    x = jnp.concatenate(scores, axis=-1)
    x = jnp.maximum(x @ params["W1"].T + params["b1"], 0.0)
    x = jnp.maximum(x @ params["W2"].T + params["b2"], 0.0)
    x = x @ params["W3"].T + params["b3"]
    logits = jnp.concatenate([jnp.full((B, 1), 0.1, jnp.float32), x], axis=-1)
    return jax.nn.softmax(logits, axis=-1)


if __name__ == "__main__":
    K = 4
    key = jax.random.PRNGKey(0)
    k_p, k_s1, k_pf = jax.random.split(key, 3)

    params = init_params(k_p, K)

    # Weight prep hoisted out of the forward path (done once per param set).
    prep_f32 = prepare_actor_params(params, matmul_dtype=jnp.float32)
    prep_bf16 = prepare_actor_params(params, matmul_dtype=jnp.bfloat16)

    for batch in (8, 20):   # 20 exercises the multi-step grid + padded tile path
        ks1, kpf = jax.random.fold_in(k_s1, batch), jax.random.fold_in(k_pf, batch)
        s1_tensor = jax.random.normal(ks1, (batch, K, 5), jnp.float32)
        pf_logits = jax.random.normal(kpf, (batch, K + 1), jnp.float32)
        portfolio = jax.nn.softmax(pf_logits, axis=-1)[..., None]   # (B, K+1, 1)

        ref = actor_forward_ref(s1_tensor, portfolio, params)

        # f32 matmul + f32 output path: tight structural check.
        out_f32 = jax.block_until_ready(
            actor_forward(s1_tensor, portfolio, prep_f32,
                          out_dtype=jnp.float32))
        assert out_f32.shape == (batch, K + 1)
        assert jnp.allclose(out_f32, ref, atol=1e-5, rtol=1e-5), (
            f"f32 max abs err = {jnp.max(jnp.abs(out_f32 - ref))}")

        # bf16 matmul + bf16 output path (production default): looser tolerance.
        out_bf16 = jax.block_until_ready(
            actor_forward(s1_tensor, portfolio, prep_bf16))
        assert out_bf16.shape == (batch, K + 1)
        assert jnp.allclose(out_bf16, ref, atol=2e-2, rtol=2e-2), (
            f"bf16 max abs err = {jnp.max(jnp.abs(out_bf16 - ref))}")

    print("KERNEL_OK")
</pallas_src>

<mosaic_0001>
module attributes {stable_mosaic.version = 11 : i64} {
  func.func @actor_kernel(%arg0: i32, %arg1: memref<8x28xf32, #tpu.memory_space<vmem>>, %arg2: memref<28x128xf32, #tpu.memory_space<vmem>>, %arg3: memref<1x128xf32, #tpu.memory_space<vmem>>, %arg4: memref<128x64xf32, #tpu.memory_space<vmem>>, %arg5: memref<1x64xf32, #tpu.memory_space<vmem>>, %arg6: memref<64x128xf32, #tpu.memory_space<vmem>>, %arg7: memref<1x128xf32, #tpu.memory_space<vmem>>, %arg8: memref<8x128xf32, #tpu.memory_space<vmem>>) attributes {dimension_semantics = [#tpu.dimension_semantics<parallel>], iteration_bounds = array<i64: 1>, scalar_prefetch = 0 : i64, scratch_operands = 0 : i64, tpu.core_type = #tpu.core_type<tc>, window_params = [{transform_indices = @transform_0, window_bounds = array<i64: 8, 28>}, {pipeline_mode = #tpu.pipeline_mode<synchronous>, transform_indices = @transform_1, window_bounds = array<i64: 28, 128>}, {pipeline_mode = #tpu.pipeline_mode<synchronous>, transform_indices = @transform_2, window_bounds = array<i64: 1, 128>}, {pipeline_mode = #tpu.pipeline_mode<synchronous>, transform_indices = @transform_3, window_bounds = array<i64: 128, 64>}, {pipeline_mode = #tpu.pipeline_mode<synchronous>, transform_indices = @transform_4, window_bounds = array<i64: 1, 64>}, {pipeline_mode = #tpu.pipeline_mode<synchronous>, transform_indices = @transform_5, window_bounds = array<i64: 64, 128>}, {pipeline_mode = #tpu.pipeline_mode<synchronous>, transform_indices = @transform_6, window_bounds = array<i64: 1, 128>}, {transform_indices = @transform_7, window_bounds = array<i64: 8, 128>}]} {
    %c0 = arith.constant 0 : index
    %c0_0 = arith.constant 0 : index
    %0 = vector.load %arg1[%c0, %c0_0] : memref<8x28xf32, #tpu.memory_space<vmem>>, vector<8x28xf32>
    %c0_1 = arith.constant 0 : index
    %c0_2 = arith.constant 0 : index
    %1 = vector.load %arg2[%c0_1, %c0_2] : memref<28x128xf32, #tpu.memory_space<vmem>>, vector<28x128xf32>
    %cst = arith.constant dense<0.000000e+00> : vector<8x128xf32>
    %2 = tpu.matmul %0, %1, %cst {dimension_numbers = #tpu.dot_dimension_numbers<[1], [0], [0], [1], [0, 0, 1, 1], [], []>} : vector<8x28xf32>, vector<28x128xf32>, vector<8x128xf32> -> vector<8x128xf32>
    %c0_3 = arith.constant 0 : index
    %c0_4 = arith.constant 0 : index
    %3 = vector.load %arg3[%c0_3, %c0_4] : memref<1x128xf32, #tpu.memory_space<vmem>>, vector<1x128xf32>
    %4 = vector.broadcast %3 : vector<1x128xf32> to vector<8x128xf32>
    %5 = arith.addf %2, %4 : vector<8x128xf32>
    %cst_5 = arith.constant 0.000000e+00 : f32
    %6 = vector.broadcast %cst_5 : f32 to vector<8x128xf32>
    %7 = arith.maximumf %5, %6 : vector<8x128xf32>
    %c0_6 = arith.constant 0 : index
    %c0_7 = arith.constant 0 : index
    %8 = vector.load %arg4[%c0_6, %c0_7] : memref<128x64xf32, #tpu.memory_space<vmem>>, vector<128x64xf32>
    %cst_8 = arith.constant dense<0.000000e+00> : vector<8x64xf32>
    %9 = tpu.matmul %7, %8, %cst_8 {dimension_numbers = #tpu.dot_dimension_numbers<[1], [0], [0], [1], [0, 0, 1, 1], [], []>} : vector<8x128xf32>, vector<128x64xf32>, vector<8x64xf32> -> vector<8x64xf32>
    %c0_9 = arith.constant 0 : index
    %c0_10 = arith.constant 0 : index
    %10 = vector.load %arg5[%c0_9, %c0_10] : memref<1x64xf32, #tpu.memory_space<vmem>>, vector<1x64xf32>
    %11 = vector.broadcast %10 : vector<1x64xf32> to vector<8x64xf32>
    %12 = arith.addf %9, %11 : vector<8x64xf32>
    %cst_11 = arith.constant 0.000000e+00 : f32
    %13 = vector.broadcast %cst_11 : f32 to vector<8x64xf32>
    %14 = arith.maximumf %12, %13 : vector<8x64xf32>
    %c0_12 = arith.constant 0 : index
    %c0_13 = arith.constant 0 : index
    %15 = vector.load %arg6[%c0_12, %c0_13] : memref<64x128xf32, #tpu.memory_space<vmem>>, vector<64x128xf32>
    %cst_14 = arith.constant dense<0.000000e+00> : vector<8x128xf32>
    %16 = tpu.matmul %14, %15, %cst_14 {dimension_numbers = #tpu.dot_dimension_numbers<[1], [0], [0], [1], [0, 0, 1, 1], [], []>} : vector<8x64xf32>, vector<64x128xf32>, vector<8x128xf32> -> vector<8x128xf32>
    %c0_15 = arith.constant 0 : index
    %c0_16 = arith.constant 0 : index
    %17 = vector.load %arg7[%c0_15, %c0_16] : memref<1x128xf32, #tpu.memory_space<vmem>>, vector<1x128xf32>
    %18 = vector.broadcast %17 : vector<1x128xf32> to vector<8x128xf32>
    %19 = arith.addf %16, %18 : vector<8x128xf32>
    %cst_17 = arith.constant dense<0xFF800000> : vector<8xf32>
    %20 = vector.multi_reduction <maximumf>, %19, %cst_17 [1] : vector<8x128xf32> to vector<8xf32>
    %21 = vector.shape_cast %20 : vector<8xf32> to vector<8x1xf32>
    %22 = vector.broadcast %21 : vector<8x1xf32> to vector<8x128xf32>
    %23 = arith.subf %19, %22 : vector<8x128xf32>
    %24 = math.exp %23 : vector<8x128xf32>
    %cst_18 = arith.constant dense<0.000000e+00> : vector<8xf32>
    %25 = vector.multi_reduction <add>, %24, %cst_18 [1] : vector<8x128xf32> to vector<8xf32>
    %26 = vector.shape_cast %25 : vector<8xf32> to vector<8x1xf32>
    %27 = tpu.reciprocal %26 : vector<8x1xf32> -> vector<8x1xf32>
    %28 = vector.broadcast %27 : vector<8x1xf32> to vector<8x128xf32>
    %29 = arith.mulf %24, %28 : vector<8x128xf32>
    %c0_19 = arith.constant 0 : index
    %c0_20 = arith.constant 0 : index
    %30 = vector.load %arg8[%c0_19, %c0_20] : memref<8x128xf32, #tpu.memory_space<vmem>>, vector<8x128xf32>
    tpu.vector_store %arg8[%c0_19, %c0_20], %29 {strides = array<i32>} : memref<8x128xf32, #tpu.memory_space<vmem>>, vector<8x128xf32>,
    return
  }
  func.func @transform_0(%arg0: i32) -> (i32, i32) {
    %c0_i32 = arith.constant 0 : i32
    %c0_i32_0 = arith.constant 0 : i32
    return %arg0, %c0_i32 : i32, i32
  }
  func.func @transform_1(%arg0: i32) -> (i32, i32) {
    %c0_i32 = arith.constant 0 : i32
    %c0_i32_0 = arith.constant 0 : i32
    %c0_i32_1 = arith.constant 0 : i32
    return %c0_i32, %c0_i32_0 : i32, i32
  }
  func.func @transform_2(%arg0: i32) -> (i32, i32) {
    %c0_i32 = arith.constant 0 : i32
    %c0_i32_0 = arith.constant 0 : i32
    %c0_i32_1 = arith.constant 0 : i32
    return %c0_i32, %c0_i32_0 : i32, i32
  }
  func.func @transform_3(%arg0: i32) -> (i32, i32) {
    %c0_i32 = arith.constant 0 : i32
    %c0_i32_0 = arith.constant 0 : i32
    %c0_i32_1 = arith.constant 0 : i32
    return %c0_i32, %c0_i32_0 : i32, i32
  }
  func.func @transform_4(%arg0: i32) -> (i32, i32) {
    %c0_i32 = arith.constant 0 : i32
    %c0_i32_0 = arith.constant 0 : i32
    %c0_i32_1 = arith.constant 0 : i32
    return %c0_i32, %c0_i32_0 : i32, i32
  }
  func.func @transform_5(%arg0: i32) -> (i32, i32) {
    %c0_i32 = arith.constant 0 : i32
    %c0_i32_0 = arith.constant 0 : i32
    %c0_i32_1 = arith.constant 0 : i32
    return %c0_i32, %c0_i32_0 : i32, i32
  }
  func.func @transform_6(%arg0: i32) -> (i32, i32) {
    %c0_i32 = arith.constant 0 : i32
    %c0_i32_0 = arith.constant 0 : i32
    %c0_i32_1 = arith.constant 0 : i32
    return %c0_i32, %c0_i32_0 : i32, i32
  }
  func.func @transform_7(%arg0: i32) -> (i32, i32) {
    %c0_i32 = arith.constant 0 : i32
    %c0_i32_0 = arith.constant 0 : i32
    return %arg0, %c0_i32 : i32, i32
  }
}

</mosaic_0001>

<bundles_post_ra>
// kernel: tpu_custom_call.1
= control target key start
LH: loop header
LB: loop body
LE: loop exit
PB: predicated region body
PF: predicated region fallthrough
CT: control target
= control target key end

     0   :  { %vm43_vm0 = vcmask 1043456   ;;  %v503_v3 = vmov 0.0|0.0   ;;  %vm504_vm1 = vmmov 0   ;;  %v505_v6 = vmov 0.0   ;;  %s674_s0 = inlined_call_operand.vmem [shape: f32[8,28], index: 0, kind: input, shape index: {}]   ;;  %s675_s1 = inlined_call_operand.vmem [shape: f32[28,128], index: 1, kind: input, shape index: {}]   ;;  %s676_s2 = inlined_call_operand.vmem [shape: f32[1,128], index: 2, kind: input, shape index: {}]   ;;  %s677_s3 = inlined_call_operand.vmem [shape: f32[128,64], index: 3, kind: input, shape index: {}]   ;;  %s678_s4 = inlined_call_operand.vmem [shape: f32[1,64], index: 4, kind: input, shape index: {}]   ;;  %s679_s5 = inlined_call_operand.vmem [shape: f32[64,128], index: 5, kind: input, shape index: {}]   ;;  %s680_s6 = inlined_call_operand.vmem [shape: f32[1,128], index: 6, kind: input, shape index: {}]   ;;  %s681_s7 = inlined_call_operand.hbm [shape: f32[8,128], index: 7, kind: output, shape index: {}]  }
   0x1   :  { %v28_v0 = vld [vmem:[%s675_s1] sm:$0xff]  ;;  %v29_v1 = vld [vmem:[%s675_s1 + $0x8] sm:$0xff]  ;;  %v30_v2 = vld [vmem:[%s675_s1 + $0x10] sm:$0xff]  ;;  %427 = vmatprep.subr.bf16.mxu0 %v503_v3  ;;  %434 = vmatprep.subr.bf16.mxu1 %v503_v3  ;;  %vm506_vm2 = vmmov 1   ;;  %vm39_vm4 = vcmask 228352  }
   0x2   :  { %v428_v4 = vpack.c.bf16 %v29_v1, %v28_v0  ;;  %v31_v5 = vld [vmem:[%s675_s1 + $0x18] sm:$0xf]  ;;  %370 = vmatprep.mubr.msk.f32.mxu0 %vm504_vm1, %v505_v6  ;;  %v118_v7 = vld [vmem:[%s677_s3] sm:$0xff]  ;;  %v119_v8 = vld [vmem:[%s677_s3 + $0x8] sm:$0xff]  ;;  %405 = vmatprep.mubr.msk.f32.mxu1 %vm504_vm1, %v505_v6 }
   0x3   :  { %v120_v9 = vld [vmem:[%s677_s3 + $0x10] sm:$0xff]  ;;  %v431_v10 = vpack.c.bf16 %v31_v5, %v30_v2  ;;  %v435_v11 = vpack.c.bf16 %v119_v8, %v118_v7  ;;  %v121_v12 = vld [vmem:[%s677_s3 + $0x18] sm:$0xff]  ;;  %vm432_vm3 = vmpackc.low %vm43_vm0, %vm506_vm2 }
   0x4   :  { %429 = vmatpush3.bf16.msra.mxu0 %v428_v4  ;;  %v438_v13 = vpack.c.bf16 %v121_v12, %v120_v9  ;;  %v122_v14 = vld [vmem:[%s677_s3 + $0x20] sm:$0xff]  ;;  %v123_v15 = vld [vmem:[%s677_s3 + $0x28] sm:$0xff] }
   0x5   :  { %430 = vmatprep.subr.bf16.mxu0 %v503_v3  ;;  %436 = vmatpush3.bf16.msra.mxu1 %v435_v11  ;;  %v27_v16 = vld [vmem:[%s674_s0] sm:$0xff] }
   0x6   :  { %437 = vmatprep.subr.bf16.mxu1 %v503_v3 }
   0x8   :  { %433 = vmatpush3.bf16.msk.msra.mxu0 %vm432_vm3, %v431_v10 }
   0x9   :  { %12 = vsyncpa [#allocation3], 0  ;;  %458 = vmatprep.subr.bf16.mxu0 %v503_v3  ;;  %439 = vmatpush3.bf16.msra.mxu1 %v438_v13  ;;  %v441_v17 = vpack.c.bf16 %v123_v15, %v122_v14  ;;  %v124_v18 = vld [vmem:[%s677_s3 + $0x30] sm:$0xff]  ;;  %v125_v19 = vld [vmem:[%s677_s3 + $0x38] sm:$0xff]  ;;  %vm227_vm5 = vcmask 523264  }
   0xa   :  { %440 = vmatprep.subr.bf16.mxu1 %v503_v3  ;;  %v444_v20 = vpack.c.bf16 %v125_v19, %v124_v18  ;;  %v126_v21 = vld [vmem:[%s677_s3 + $0x40] sm:$0xff]  ;;  %v127_v22 = vld [vmem:[%s677_s3 + $0x48] sm:$0xff]  ;;  %v128_v24 = vld [vmem:[%s677_s3 + $0x50] sm:$0xff] }
   0xb   :  { %371 = vmatmul.mubr.msk.f32.vlgmr.msra.gmra.mrb[0].mxu0 %vm39_vm4, %v27_v16  ;;  %v447_v23 = vpack.c.bf16 %v127_v22, %v126_v21  ;;  %v129_v25 = vld [vmem:[%s677_s3 + $0x58] sm:$0xff]  ;;  %v130_v27 = vld [vmem:[%s677_s3 + $0x60] sm:$0xff]  ;;  %v131_v28 = vld [vmem:[%s677_s3 + $0x68] sm:$0xff] }
   0xc   :  { %424 = vmatprep.mubr.msk.f32.mxu0 %vm504_vm1, %v505_v6  ;;  %v450_v26 = vpack.c.bf16 %v129_v25, %v128_v24  ;;  %v453_v29 = vpack.c.bf16 %v131_v28, %v130_v27  ;;  %v132_v30 = vld [vmem:[%s677_s3 + $0x70] sm:$0xff]  ;;  %v133_v31 = vld [vmem:[%s677_s3 + $0x78] sm:$0xff]  ;;  %v212_v33 = vld [vmem:[%s679_s5] sm:$0xff] }
   0xd   :  { %442 = vmatpush3.bf16.msra.mxu1 %v441_v17  ;;  %v456_v32 = vpack.c.bf16 %v133_v31, %v132_v30  ;;  %v213_v34 = vld [vmem:[%s679_s5 + $0x8] sm:$0xff]  ;;  %v214_v35 = vld [vmem:[%s679_s5 + $0x10] sm:$0xff]  ;;  %v215_v37 = vld [vmem:[%s679_s5 + $0x18] sm:$0xff] }
   0xe   :  { %443 = vmatprep.subr.bf16.mxu1 %v503_v3  ;;  %v459_v36 = vpack.c.bf16 %v213_v34, %v212_v33  ;;  %v462_v38 = vpack.c.bf16 %v215_v37, %v214_v35  ;;  %v216_v39 = vld [vmem:[%s679_s5 + $0x20] sm:$0xff]  ;;  %v217_v40 = vld [vmem:[%s679_s5 + $0x28] sm:$0xff]  ;;  %v218_v47 = vld [vmem:[%s679_s5 + $0x30] sm:$0xff] }
   0xf   :  { %v465_v41 = vpack.c.bf16 %v217_v40, %v216_v39  ;;  %v325_v42 = vld [vmem:[%s676_s2] ss:$0 sm:$0xff]  ;;  %v219_v48 = vld [vmem:[%s679_s5 + $0x38] sm:$0xff] }
  0x10   :  { %460 = vmatpush3.bf16.msra.mxu0 %v459_v36  ;;  %v468_v49 = vpack.c.bf16 %v219_v48, %v218_v47  ;;  %v328_v50 = vld [vmem:[%s678_s4] ss:$0 sm:$0xff]  ;;  %s507_s4 = smov [#allocation2]  }
  0x11   :  { %445 = vmatpush3.bf16.msra.mxu1 %v444_v20  ;;  %461 = vmatprep.subr.bf16.mxu0 %v503_v3  ;;  %v329_v55 = vld [vmem:[%s680_s6] ss:$0 sm:$0xff]  ;;  %s317_s5 = sshll.u32 %s507_s4, 4  ;;  %s318_s5 = int_to_ptr.vmem [resolvable:$true] %s317_s5 }
  0x12   :  { %446 = vmatprep.subr.bf16.mxu1 %v503_v3  ;;  %s479_s13 = scalar_lea.vmem %s318_s5, 128  ;;  %p484_p1 = scmp.lt.s32.totalorder %s318_s5, %s318_s5 }
  0x13   :  { %p480_p0 = scmp.ne.s32.totalorder %s318_s5, %s479_s13  ;;  %p485_p2 = scmp.lt.s32.totalorder %s479_s13, %s479_s13 }
  0x14   :  { %463 = vmatpush3.bf16.msra.mxu0 %v462_v38 }
  0x15   :  { %448 = vmatpush3.bf16.msra.mxu1 %v447_v23  ;;  %464 = vmatprep.subr.bf16.mxu0 %v503_v3  ;;  %p486_p3 = por %p485_p2, %p484_p1 }
  0x16   :  { %449 = vmatprep.subr.bf16.mxu1 %v503_v3 }
  0x17   :  { %p487_p4 = pnand %p486_p3, %p480_p0 }
  0x18   :  { %466 = vmatpush3.bf16.msra.mxu0 %v465_v41 }
  0x19   :  { %451 = vmatpush3.bf16.msra.mxu1 %v450_v26  ;;  %467 = vmatprep.subr.bf16.mxu0 %v503_v3 }
  0x1a   :  { %452 = vmatprep.subr.bf16.mxu1 %v503_v3 }
  0x1c   :  { %469 = vmatpush3.bf16.msra.mxu0 %v468_v49 }
  0x1d   :  { %454 = vmatpush3.bf16.msra.mxu1 %v453_v29 }
  0x1e   :  { %455 = vmatprep.subr.bf16.mxu1 %v503_v3 }
  0x21   :  { %457 = vmatpush3.bf16.msra.mxu1 %v456_v32 }
  0xde   :  { %v113_v43 = vpop.f32.mrb[0].mxu0 }
  0xdf   :  { %v114_v44 = vadd.f32 %v325_v42, %v113_v43  ;;  %v372_v45 = vpop.f32.mrb[1].mxu0 }
  0xe1   :  { %v117_v46 = vmax.f32 %v114_v44, 0.0 }
  0xe3   :  { %406 = vmatmul.mubr.f32.vlgmr.msra.gmra.mrb[0].mxu1 %v117_v46 }
 0x1b6   :  { %v207_v51 = vpop.f32.mrb[0].mxu1 }
 0x1b7   :  { %v208_v52 = vadd.f32 %v328_v50, %v207_v51  ;;  %v407_v53 = vpop.f32.mrb[1].mxu1 }
 0x1b9   :  { %v211_v54 = vmax.f32 %v208_v52, 0.0 }
 0x1bb   :  { %425 = vmatmul.mubr.msk.f32.vlgmr.msra.gmra.mrb[2].mxu0 %vm227_vm5, %v211_v54 }
 0x28e   :  { %v297_v56 = vpop.f32.mrb[2].mxu0 }
 0x28f   :  { %v298_v57 = vadd.f32 %v329_v55, %v297_v56  ;;  %v426_v58 = vpop.f32.mrb[3].mxu0 }
 0x291   :  { %301 = vmax.xlane.f32.xlu0 %v298_v57 }
 0x31e   :  { %v302_v59 = vpop.xlane.xlu0 %301 }
 0x31f   :  { %v303_v60 = vsub.f32 %v298_v57, %v302_v59 }
 0x321   :  { %v304_v61 = vmul.f32 1.442695, %v303_v60 }
 0x323   :  { %475 = vpow2.f32 %v304_v61 }
 0x32d   :  { %v476_v62 = vpop.eup %475 }
 0x32e   :  { %306 = vadd.xlane.f32.xlu0 %v476_v62 }
 0x3bb   :  { %v307_v63 = vpop.xlane.xlu0 %306 }
 0x3bc   :  { %477 = vrcp.f32 %v307_v63 }
 0x3c6   :  { %v478_v0 = vpop.eup %477 }
 0x3c7   :  { %v309_v1 = vmul.f32 %v478_v0, %v476_v62 }
 0x3c9   :  { %310 = vst [vmem:[#allocation2] sm:$0xff] %v309_v1 }
 0x3ca   :  { %490 = shalt.err (!%p487_p4)
}
 0x3cb   :  { %s491_s1 = scalar_lea.hbm %s681_s7, 128 }
 0x3cc   :  { %p492_p5 = scmp.ne.s32.totalorder %s681_s7, %s491_s1  ;;  %p495_p6 = scmp.lt.u32.totalorder %s491_s1, %s681_s7 }
 0x3ce   :  { %p497_p7 = pnand %p495_p6, %p492_p5 }
 0x3d0   :  { %500 = shalt.err (!%p497_p7)
}
 0x3d1   :  { %320 = dma.vmem_to_hbm [thread:$0]  %s318_s5, 128, %s681_s7, [#allocation3]  }
 0x3d2   :  { %501 = dma.done.wait [#allocation3], 128  }
 0x3d3   :  { %502 = vsyncadd [#allocation3], 4294967168 }
 0x3d4   :  { %324 = vsyncpa [#allocation3], 1 }

</bundles_post_ra>
